<compile_context>
chip_gen: v7x
topology: tpu7x:2x2x1
jax: 0.10.0
libtpu: 0.0.40
codegen_flags: <defaults>
</compile_context>

<pallas_src>
import functools

import jax
import jax.numpy as jnp
from jax import lax
from jax.experimental import pallas as pl
from jax.experimental.pallas import tpu as pltpu

BN_EPS = 1e-5
L2_EPS = 1e-12
LANE = 128           # nodes live on lanes
BF16_SUBLANE = 16    # bf16 packs 16 rows per vreg


def _round_up(x, m):
    return (x + m - 1) // m * m


def _vmem_limit_bytes():
    # Generation-aware VMEM budget: ~3/4 of physical VMEM, capped at 112 MiB.
    #   v7x  (64 MiB physical)  -> 48 MiB
    #   v5e/v6e (128 MiB)       -> 96 MiB
    # Conservative fallback = 64 MiB (smallest generation), so we never request
    # more scoped VMEM than v7x physically has.
    cap = 64 << 20
    try:
        info = pltpu.get_tpu_info()
        cap = int(getattr(info, "vmem_capacity_bytes", cap) or cap)
    except Exception:
        pass
    return int(min(cap * 3 // 4, 112 << 20))


def _resident_spec(block_shape, index_map):
    """BlockSpec for an operand whose block index never changes across the
    grid: request single-buffering (resident in VMEM) when this JAX build
    supports pipeline_mode; otherwise fall back to the default spec."""
    if hasattr(pl, "Buffered"):
        try:
            return pl.BlockSpec(block_shape, index_map,
                                pipeline_mode=pl.Buffered(1))
        except TypeError:
            pass
    return pl.BlockSpec(block_shape, index_map)


def _stage_kernel(a_ref, ht0_ref, wt_ref, bt_ref, o_ref, hbuf, *, has_l2norm):
    """One grid step == one GNN layer. A and the running H^T stay in VMEM.

    Shapes (transposed layout):
      a_ref   [n_pad, n_pad]  bf16   (symmetric, resident)
      ht0_ref [d_pad, n_pad]  bf16   (initial H^T, resident)
      wt_ref  [d_pad, d_pad]  bf16   (BN-folded W'^T for this layer)
      bt_ref  [d_pad, 1]      f32    (BN-folded bias^T for this layer)
      o_ref   [d_pad, n_pad]  f32
      hbuf    [d_pad, n_pad]  bf16   (running H^T scratch)
    """
    layer = pl.program_id(0)

    @pl.when(layer == 0)
    def _():
        hbuf[...] = ht0_ref[...]

    # Feature transform then aggregation, both on the MXU (bf16 in, f32 acc):
    #   HW^T = W'^T @ H^T   [d, N]
    #   Z^T  = HW^T @ A     [d, N]   (uses A = A^T)
    hw = jnp.dot(wt_ref[...], hbuf[...], preferred_element_type=jnp.float32)
    z = jnp.dot(hw.astype(jnp.bfloat16), a_ref[...],
                preferred_element_type=jnp.float32)

    # Folded eval-mode BN / GCN bias, dropout = identity (eval), ReLU.
    z = z + bt_ref[...]
    z = jnp.maximum(z, 0.0)

    if has_l2norm:
        # F.normalize(z, p=2, dim=-1): the per-node norm reduces over features,
        # i.e. over SUBLANES in this transposed layout.
        ssq = jnp.sum(z * z, axis=0, keepdims=True)          # [1, n_pad]
        z = z * lax.rsqrt(jnp.maximum(ssq, L2_EPS * L2_EPS))

    hbuf[...] = z.astype(hbuf.dtype)
    # Output block index is constant across layers, so HBM writeback happens
    # only once after the last grid step; storing every step keeps the block
    # always-initialized and costs only a tiny VMEM store.
    o_ref[...] = z.astype(o_ref.dtype)


def _fold_layer(params, has_bn):
    """Fold eval-mode BatchNorm (an affine map) into the GCN weight / bias,
    returning the TRANSPOSED weight W'^T [d_out, d_in] and bias^T [d_out, 1]."""
    w = params["w"].astype(jnp.float32)                    # [d_in, d_out]
    if has_bn:
        scale = params["gamma"] * lax.rsqrt(params["var"] + BN_EPS)  # [1, d_out]
        w = w * scale
        b = params["beta"] - params["mean"] * scale
    else:
        b = params["b"]
    return w.T, b.reshape(-1, 1).astype(jnp.float32)


def gnn_stack_stage(adj, h, layer_params, *, has_bn=True, has_l2norm=True):
    """Forward pass of GNNStackStage as a single fused Pallas kernel."""
    n, d_in0 = h.shape
    d_out = layer_params[0]["w"].shape[1]
    num_layers = len(layer_params)

    # Nodes on lanes (multiple of 128); features on sublanes (multiple of the
    # bf16 sublane tile).  No padding of the feature dim to 128.
    n_pad = _round_up(n, LANE)
    d_pad = _round_up(max(d_in0, d_out), BF16_SUBLANE)

    # Stack per-layer (BN-folded, zero-padded, transposed) weights/biases.
    wt_stack = jnp.zeros((num_layers, d_pad, d_pad), jnp.float32)
    bt_stack = jnp.zeros((num_layers, d_pad, 1), jnp.float32)
    for i, p in enumerate(layer_params):
        wt_i, bt_i = _fold_layer(p, has_bn)          # [d_out, d_in], [d_out, 1]
        do, di = wt_i.shape
        wt_stack = wt_stack.at[i, :do, :di].set(wt_i)
        bt_stack = bt_stack.at[i, :do, :].set(bt_i)

    a_pad = jnp.zeros((n_pad, n_pad), jnp.float32).at[:n, :n].set(adj)
    ht_pad = jnp.zeros((d_pad, n_pad), jnp.float32).at[:d_in0, :n].set(h.T)

    kernel = functools.partial(_stage_kernel, has_l2norm=has_l2norm)

    out_t = pl.pallas_call(
        kernel,
        out_shape=jax.ShapeDtypeStruct((d_pad, n_pad), jnp.float32),
        grid_spec=pltpu.PrefetchScalarGridSpec(
            num_scalar_prefetch=0,
            grid=(num_layers,),
            in_specs=[
                _resident_spec((n_pad, n_pad), lambda l: (0, 0)),       # A (resident)
                _resident_spec((d_pad, n_pad), lambda l: (0, 0)),       # H0^T (resident)
                pl.BlockSpec((None, d_pad, d_pad), lambda l: (l, 0, 0)),  # W'^T_l (pipelined)
                pl.BlockSpec((None, d_pad, 1), lambda l: (l, 0, 0)),      # b'^T_l
            ],
            out_specs=_resident_spec((d_pad, n_pad), lambda l: (0, 0)),
            scratch_shapes=[pltpu.VMEM((d_pad, n_pad), jnp.bfloat16)],   # running H^T
        ),
        compiler_params=pltpu.CompilerParams(
            dimension_semantics=("arbitrary",),   # layers are strictly sequential
            vmem_limit_bytes=_vmem_limit_bytes(),
        ),
    )(a_pad.astype(jnp.bfloat16), ht_pad.astype(jnp.bfloat16),
      wt_stack.astype(jnp.bfloat16), bt_stack)

    # TODO(synk): large-N path (esp. v7x, 64 MiB VMEM / 2 TCs): stream A in
    # column tiles per layer via pltpu.emit_pipeline (inner K-loop into an f32
    # accumulator) and/or add a "parallel" row-tile axis over N so both v7x
    # TensorCores split the aggregation matmul, instead of holding the full
    # [N, N] adjacency resident.
    return out_t[:d_out, :n].T


def gnn_stack_stage_ref(adj, h, layer_params, *, has_bn=True, has_l2norm=True):
    """Pure-JAX f32 reference matching the PyTorch eval-mode forward."""
    def normalize(x):
        nrm = jnp.sqrt(jnp.sum(x * x, axis=-1, keepdims=True))
        return x / jnp.maximum(nrm, L2_EPS)

    for p in layer_params:
        z = adj @ (h @ p["w"])
        if has_bn:
            z = (z - p["mean"]) * lax.rsqrt(p["var"] + BN_EPS) * p["gamma"] + p["beta"]
        else:
            z = z + p["b"]
        z = jnp.maximum(z, 0.0)  # dropout identity in eval; act = ReLU
        if has_l2norm:
            z = normalize(z)
        h = z
    if has_l2norm:
        h = normalize(h)
    return h


def make_layer_params(key, d_in, d_out):
    kw, kb, kg, kbe, km, kv = jax.random.split(key, 6)
    scale = 1.0 / jnp.sqrt(jnp.float32(d_in))
    return {
        "w": jax.random.uniform(kw, (d_in, d_out), jnp.float32, -scale, scale),
        "b": jax.random.uniform(kb, (1, d_out), jnp.float32, -scale, scale),
        "gamma": jax.random.uniform(kg, (1, d_out), jnp.float32, 0.5, 1.5),
        "beta": 0.1 * jax.random.normal(kbe, (1, d_out), jnp.float32),
        "mean": 0.1 * jax.random.normal(km, (1, d_out), jnp.float32),
        "var": jax.random.uniform(kv, (1, d_out), jnp.float32, 0.5, 1.5),
    }


def make_normalized_adj(key, n):
    # Random sparse-ish symmetric graph, add self loops, D^-1/2 (A+I) D^-1/2.
    logits = jax.random.uniform(key, (n, n), jnp.float32)
    a = (logits > 0.9).astype(jnp.float32)
    a = jnp.maximum(a, a.T)
    a = a + jnp.eye(n, dtype=jnp.float32)
    deg = jnp.sum(a, axis=-1)
    d_inv_sqrt = lax.rsqrt(deg)
    return a * d_inv_sqrt[:, None] * d_inv_sqrt[None, :]


if __name__ == "__main__":
    N = 256        # number of nodes
    DIM_IN = 32    # input feature dim
    DIM_OUT = 32   # hidden/output feature dim
    NUM_LAYERS = 3

    key = jax.random.PRNGKey(0)
    k_adj, k_h, *layer_keys = jax.random.split(key, 2 + NUM_LAYERS)

    adj = make_normalized_adj(k_adj, N)
    h = jax.random.normal(k_h, (N, DIM_IN), jnp.float32)

    layer_params = []
    for i in range(NUM_LAYERS):
        d_in = DIM_IN if i == 0 else DIM_OUT
        layer_params.append(make_layer_params(layer_keys[i], d_in, DIM_OUT))

    out = gnn_stack_stage(adj, h, layer_params, has_bn=True, has_l2norm=True)
    out = jax.block_until_ready(out)

    assert out.shape == (N, DIM_OUT)
    assert bool(jnp.all(jnp.isfinite(out)))

    # Correctness vs. pure-JAX f32 reference (kernel uses bf16 operands with
    # f32 accumulation, so allow a modest tolerance).
    ref = gnn_stack_stage_ref(adj, h, layer_params, has_bn=True, has_l2norm=True)
    max_err = float(jnp.max(jnp.abs(out - ref)))
    assert max_err < 5e-2, f"max abs error too large: {max_err}"

    print("KERNEL_OK")
</pallas_src>

<mosaic_0001>
module attributes {stable_mosaic.version = 11 : i64} {
  func.func @_stage_kernel(%arg0: i32, %arg1: memref<256x256xbf16, #tpu.memory_space<vmem>>, %arg2: memref<32x256xbf16, #tpu.memory_space<vmem>>, %arg3: memref<1x32x32xbf16, #tpu.memory_space<vmem>>, %arg4: memref<1x32x1xf32, #tpu.memory_space<vmem>>, %arg5: memref<32x256xf32, #tpu.memory_space<vmem>>, %arg6: memref<32x256xbf16, #tpu.memory_space<vmem>>) attributes {dimension_semantics = [#tpu.dimension_semantics<arbitrary>], iteration_bounds = array<i64: 3>, scalar_prefetch = 0 : i64, scratch_operands = 1 : i64, tpu.core_type = #tpu.core_type<tc>, window_params = [{pipeline_mode = #tpu.pipeline_mode<synchronous>, transform_indices = @transform_0, window_bounds = array<i64: 256, 256>}, {pipeline_mode = #tpu.pipeline_mode<synchronous>, transform_indices = @transform_1, window_bounds = array<i64: 32, 256>}, {transform_indices = @transform_2, window_bounds = array<i64: 1, 32, 32>}, {transform_indices = @transform_3, window_bounds = array<i64: 1, 32, 1>}, {pipeline_mode = #tpu.pipeline_mode<synchronous>, transform_indices = @transform_4, window_bounds = array<i64: 32, 256>}]} {
    %c0_i32 = arith.constant 0 : i32
    %0 = arith.cmpi eq, %arg0, %c0_i32 : i32
    %1 = arith.extui %0 : i1 to i32
    %c0_i32_0 = arith.constant 0 : i32
    %2 = arith.cmpi ne, %1, %c0_i32_0 : i32
    scf.if %2 {
      %c0_18 = arith.constant 0 : index
      %c0_19 = arith.constant 0 : index
      %27 = vector.load %arg2[%c0_18, %c0_19] : memref<32x256xbf16, #tpu.memory_space<vmem>>, vector<32x256xbf16>
      %c0_20 = arith.constant 0 : index
      %c0_21 = arith.constant 0 : index
      %28 = vector.load %arg6[%c0_20, %c0_21] : memref<32x256xbf16, #tpu.memory_space<vmem>>, vector<32x256xbf16>
      tpu.vector_store %arg6[%c0_20, %c0_21], %27 {strides = array<i32>} : memref<32x256xbf16, #tpu.memory_space<vmem>>, vector<32x256xbf16>,
    } else {
    }
    %c0 = arith.constant 0 : index
    %c0_1 = arith.constant 0 : index
    %c0_2 = arith.constant 0 : index
    %3 = vector.load %arg3[%c0, %c0_1, %c0_2] : memref<1x32x32xbf16, #tpu.memory_space<vmem>>, vector<1x32x32xbf16>
    %4 = vector.shape_cast %3 : vector<1x32x32xbf16> to vector<32x32xbf16>
    %c0_3 = arith.constant 0 : index
    %c0_4 = arith.constant 0 : index
    %5 = vector.load %arg6[%c0_3, %c0_4] : memref<32x256xbf16, #tpu.memory_space<vmem>>, vector<32x256xbf16>
    %cst = arith.constant dense<0.000000e+00> : vector<32x256xf32>
    %6 = tpu.matmul %4, %5, %cst {dimension_numbers = #tpu.dot_dimension_numbers<[1], [0], [0], [1], [0, 0, 1, 1], [], []>} : vector<32x32xbf16>, vector<32x256xbf16>, vector<32x256xf32> -> vector<32x256xf32>
    %7 = arith.truncf %6 : vector<32x256xf32> to vector<32x256xbf16>
    %c0_5 = arith.constant 0 : index
    %c0_6 = arith.constant 0 : index
    %8 = vector.load %arg1[%c0_5, %c0_6] : memref<256x256xbf16, #tpu.memory_space<vmem>>, vector<256x256xbf16>
    %cst_7 = arith.constant dense<0.000000e+00> : vector<32x256xf32>
    %9 = tpu.matmul %7, %8, %cst_7 {dimension_numbers = #tpu.dot_dimension_numbers<[1], [0], [0], [1], [0, 0, 1, 1], [], []>} : vector<32x256xbf16>, vector<256x256xbf16>, vector<32x256xf32> -> vector<32x256xf32>
    %c0_8 = arith.constant 0 : index
    %c0_9 = arith.constant 0 : index
    %c0_10 = arith.constant 0 : index
    %10 = vector.load %arg4[%c0_8, %c0_9, %c0_10] : memref<1x32x1xf32, #tpu.memory_space<vmem>>, vector<1x32x1xf32>
    %11 = vector.shape_cast %10 : vector<1x32x1xf32> to vector<32x1xf32>
    %12 = vector.broadcast %11 : vector<32x1xf32> to vector<32x256xf32>
    %13 = arith.addf %9, %12 : vector<32x256xf32>
    %cst_11 = arith.constant 0.000000e+00 : f32
    %14 = vector.broadcast %cst_11 : f32 to vector<32x256xf32>
    %15 = arith.maximumf %13, %14 : vector<32x256xf32>
    %16 = arith.mulf %15, %15 : vector<32x256xf32>
    %cst_12 = arith.constant dense<0.000000e+00> : vector<256xf32>
    %17 = vector.multi_reduction <add>, %16, %cst_12 [0] : vector<32x256xf32> to vector<256xf32>
    %18 = vector.shape_cast %17 : vector<256xf32> to vector<1x256xf32>
    %cst_13 = arith.constant 1.000000e-24 : f32
    %19 = vector.broadcast %cst_13 : f32 to vector<1x256xf32>
    %20 = arith.maximumf %18, %19 : vector<1x256xf32>
    %21 = math.rsqrt %20 : vector<1x256xf32>
    %22 = vector.broadcast %21 : vector<1x256xf32> to vector<32x256xf32>
    %23 = arith.mulf %15, %22 : vector<32x256xf32>
    %24 = arith.truncf %23 : vector<32x256xf32> to vector<32x256xbf16>
    %c0_14 = arith.constant 0 : index
    %c0_15 = arith.constant 0 : index
    %25 = vector.load %arg6[%c0_14, %c0_15] : memref<32x256xbf16, #tpu.memory_space<vmem>>, vector<32x256xbf16>
    tpu.vector_store %arg6[%c0_14, %c0_15], %24 {strides = array<i32>} : memref<32x256xbf16, #tpu.memory_space<vmem>>, vector<32x256xbf16>,
    %c0_16 = arith.constant 0 : index
    %c0_17 = arith.constant 0 : index
    %26 = vector.load %arg5[%c0_16, %c0_17] : memref<32x256xf32, #tpu.memory_space<vmem>>, vector<32x256xf32>
    tpu.vector_store %arg5[%c0_16, %c0_17], %23 {strides = array<i32>} : memref<32x256xf32, #tpu.memory_space<vmem>>, vector<32x256xf32>,
    return
  }
  func.func @transform_0(%arg0: i32) -> (i32, i32) {
    %c0_i32 = arith.constant 0 : i32
    %c0_i32_0 = arith.constant 0 : i32
    %c0_i32_1 = arith.constant 0 : i32
    return %c0_i32, %c0_i32_0 : i32, i32
  }
  func.func @transform_1(%arg0: i32) -> (i32, i32) {
    %c0_i32 = arith.constant 0 : i32
    %c0_i32_0 = arith.constant 0 : i32
    %c0_i32_1 = arith.constant 0 : i32
    return %c0_i32, %c0_i32_0 : i32, i32
  }
  func.func @transform_2(%arg0: i32) -> (i32, i32, i32) {
    %c0_i32 = arith.constant 0 : i32
    %c0_i32_0 = arith.constant 0 : i32
    %c0_i32_1 = arith.constant 0 : i32
    return %arg0, %c0_i32, %c0_i32_0 : i32, i32, i32
  }
  func.func @transform_3(%arg0: i32) -> (i32, i32, i32) {
    %c0_i32 = arith.constant 0 : i32
    %c0_i32_0 = arith.constant 0 : i32
    %c0_i32_1 = arith.constant 0 : i32
    return %arg0, %c0_i32, %c0_i32_0 : i32, i32, i32
  }
  func.func @transform_4(%arg0: i32) -> (i32, i32) {
    %c0_i32 = arith.constant 0 : i32
    %c0_i32_0 = arith.constant 0 : i32
    %c0_i32_1 = arith.constant 0 : i32
    return %c0_i32, %c0_i32_0 : i32, i32
  }
}

</mosaic_0001>

<bundles_post_ra>
// kernel: tpu_custom_call.1
= control target key start
LH: loop header
LB: loop body
LE: loop exit
PB: predicated region body
PF: predicated region fallthrough
CT: control target
= control target key end

     0   :  { %9 = vsyncpa [#allocation4], 0  ;;  %s1102_s0 = inlined_call_operand.hbm [shape: bf16[256,256], index: 0, kind: input, shape index: {}]   ;;  %s1103_s1 = inlined_call_operand.vmem [shape: bf16[32,256], index: 1, kind: input, shape index: {}]   ;;  %s1104_s2 = inlined_call_operand.vmem [shape: bf16[3,32,32], index: 2, kind: input, shape index: {}]   ;;  %s1105_s3 = inlined_call_operand.vmem [shape: f32[3,32,1], index: 3, kind: input, shape index: {}]   ;;  %s1106_s4 = inlined_call_operand.hbm [shape: f32[32,256], index: 4, kind: output, shape index: {}]  }
   0x1   :  { %10 = vsyncpa [#allocation5], 0  ;;  %s989_s15 = smov 0  }
   0x2 LB: > { %s995_s16 = sadd.s32 4294967295, %s955_s15   ;;  %p738_p0 = scmp.ge.s32.totalorder %s955_s15, 1  ;;  %s955_s15 = sphi %s989_s15, %s16_s15  }
   0x3   : > { %p136_p1 = scmp.lt.s32.totalorder %s955_s15, 4  ;;  %s957_s17 = smov [#allocation3]  }
   0x4   : > { %s148_s18 = sshll.u32 %s957_s17, 4  ;;  %p1107_p4 = scmp.eq.s32.totalorder %s995_s16, 0  ;;  %s149_s18 = int_to_ptr.vmem [resolvable:$true] %s148_s18 }
   0x5   : > { %p1000_p3 = pnand %p738_p0, %p136_p1  ;;  %s887_s23 = scalar_lea.hbm %s1102_s0, 4096 }
   0x6   : > { %p888_p7 = scmp.ne.s32.totalorder %s1102_s0, %s887_s23  ;;  %p894_p11 = scmp.lt.u32.totalorder %s887_s23, %s1102_s0 }
   0x7   : > { %s1109_s19 = scalar_select %p1000_p3, 1, 0 }
   0x8   : > { %p802_p5 = pneg %p1000_p3 }
   0xa   : > { %p1009_p6 = pnand %p1107_p4, %p802_p5 }
   0xc   : > { %p889_p8 = pneg %p1009_p6 }
   0xe   : > { %p890_p9 = pnand %p889_p8, %p888_p7 }
  0x10   : > { %p891_p10 = pneg %p890_p9 }
  0x12   : > { %p896_p12 = pnand %p894_p11, %p891_p10 }
  0x14   : > { %899 = shalt.err (!%p896_p12)
}
  0x15   : > { %s900_s28 = scalar_lea.vmem %s149_s18, 4096  ;;  %p908_p5 = scmp.lt.s32.totalorder %s149_s18, %s149_s18 }
  0x16   : > { %p901_p13 = scmp.ne.s32.totalorder %s149_s18, %s900_s28  ;;  %p909_p2 = scmp.lt.s32.totalorder %s900_s28, %s900_s28 }
  0x18   : > { %p903_p0 = pnand %p901_p13, %p889_p8  ;;  %p910_p4 = por %p909_p2, %p908_p5 }
  0x1a   : > { %p904_p1 = pneg %p903_p0 }
  0x1c   : > { %p911_p3 = pnand %p910_p4, %p904_p1 }
  0x1e   : > { %914 = shalt.err (!%p911_p3)
}
  0x1f   : > { %s958_s29 = smov 128   ;;  %s959_s30 = smov 8  }
  0x20   : > { %805 = dma.hbm_to_vmem [thread:$0]  (!%p1009_p6), %s1102_s0, 4096, %s149_s18, [#allocation4], %s958_s29, %s958_s29, %s959_s30  }
  0x21   : > { %p1111_p7 = scmp.ne.s32.totalorder %s1109_s19, 0 }
  0x22   : > { %p1112_p9 = scmp.eq.s32.totalorder (!%p1111_p7), %s995_s16, 0 }
  0x23   : > { %183 = sbr.rel (%p1111_p7) target bundleno = 558 (0x22e), region = 36 }
  0x2a   : > { %946 = dma.done.wait (%p1112_p9), [#allocation4], 4096   ;;  %p1113_p8 = pmov %p1112_p9 }
  0x2b   : > { %p209_p2 = scmp.lt.s32.totalorder %s995_s16, 2  ;;  %p1114_p3 = scmp.ne.s32.totalorder %s995_s16, 0 }
  0x2c   : > { %948 = vsyncadd (%p1113_p8), [#allocation4], 4294963200  ;;  %v825_v0 = vld [vmem:[%s1103_s1] ss:$8 sps:$4 sm:$0xff] (!%p1114_p3)   ;;  %v827_v1 = vld [vmem:[%s1103_s1 + $0x4] ss:$8 sps:$4 sm:$0xff] (!%p1114_p3)  }
  0x2d   : > { %s210_s7 = scalar_select %p209_p2, %s995_s16, 2 }
  0x2e   : > { %223 = sbr.rel (%p1114_p3) target bundleno = 53 (0x35), region = 44  ;;  %248 = vst [vmem:[#allocation2] sm:$0xff] (!%p1114_p3), %v825_v0  ;;  %v828_v2 = vld [vmem:[%s1103_s1 + $0x10] ss:$8 sps:$4 sm:$0xff] (!%p1114_p3)   ;;  %v830_v3 = vld [vmem:[%s1103_s1 + $0x14] ss:$8 sps:$4 sm:$0xff] (!%p1114_p3)  }
  0x2f   : > { %s792_s8 = sshll.u32 %s210_s7, 4  ;;  %s793_s9 = sshll.u32 %s210_s7, 5  ;;  %249 = vst [vmem:[#allocation2 + $0x8] sm:$0xff] (!%p1114_p3), %v827_v1  ;;  %250 = vst [vmem:[#allocation2 + $0x10] sm:$0xff] (!%p1114_p3), %v828_v2 }
  0x30   : > { %s1040_s12 = scalar_lea.vmem %s1104_s2, %s792_s8  ;;  %s1045_s17 = scalar_lea.vmem %s1105_s3, %s793_s9  ;;  %251 = vst [vmem:[#allocation2 + $0x18] sm:$0xff] (!%p1114_p3), %v830_v3 }
  0x35 PF: > { %v256_v5 = vld [vmem:[#allocation2] sm:$0xff]  ;;  %v960_v7 = vmov 0   ;;  %v838_v12 = vld [vmem:[#allocation3 + $0x14] ss:$8 sps:$4 sm:$0xff]   ;;  %vm270_vm0 = vcmask 261120   ;;  %v834_v17 = vld [vmem:[%s1040_s12 + $0x8] sm:$0xff]  }
  0x36   : > { %v257_v4 = vld [vmem:[#allocation2 + $0x8] sm:$0xff]  ;;  %309 = vmatprep.mubr.bf16.mxu0 %v960_v7  ;;  %831 = vset.pattern.permute.xlu0 %v960_v7  ;;  %v258_v8 = vld [vmem:[#allocation2 + $0x10] sm:$0xff]  ;;  %v833_v11 = vld [vmem:[%s1040_s12] sm:$0xff]   ;;  %s961_s26 = smov [#allocation6]   ;;  %p808_p4 = scmp.eq.s32.totalorder %s995_s16, 2 }
  0x37   : > { %v259_v6 = vld [vmem:[#allocation2 + $0x18] sm:$0xff]  ;;  %277 = vmatprep.subr.bf16.mxu0 %v257_v4  ;;  %832 = vset.pattern.permute.xlu1 %v960_v7  ;;  %v835_v9 = vld [vmem:[#allocation3 + $0x4] ss:$8 sps:$4 sm:$0xff]   ;;  %v837_v10 = vld [vmem:[#allocation3] ss:$8 sps:$4 sm:$0xff]   ;;  %s671_s27 = sshll.u32 %s961_s26, 4  ;;  %s1070_s27 = int_to_ptr.vmem [resolvable:$true] %s671_s27 }
  0x38   : > { %278 = vmatpush1.bf16.msra.mxu0 %v256_v5  ;;  %550 = vmatprep.subr.bf16.mxu1 %v835_v9  ;;  %v840_v13 = vld [vmem:[#allocation3 + $0x10] ss:$8 sps:$4 sm:$0xff]   ;;  %v841_v14 = vld [vmem:[#allocation3 + $0x24] ss:$8 sps:$4 sm:$0xff]   ;;  %v843_v15 = vld [vmem:[#allocation3 + $0x20] ss:$8 sps:$4 sm:$0xff]   ;;  %p922_p12 = scmp.lt.s32.totalorder %s1070_s27, %s1070_s27 }
  0x39   : > { %279 = vmatprep.subr.bf16.mxu0 %v259_v6  ;;  %551 = vmatpush1.bf16.msra.mxu1 %v837_v10  ;;  %v844_v16 = vld [vmem:[#allocation3 + $0x34] ss:$8 sps:$4 sm:$0xff]   ;;  %v846_v18 = vld [vmem:[#allocation3 + $0x30] ss:$8 sps:$4 sm:$0xff]   ;;  %v847_v19 = vld [vmem:[#allocation3 + $0x44] ss:$8 sps:$4 sm:$0xff]  }
  0x3a   : > { %552 = vmatprep.subr.bf16.mxu1 %v838_v12  ;;  %v849_v20 = vld [vmem:[#allocation3 + $0x40] ss:$8 sps:$4 sm:$0xff]   ;;  %v850_v21 = vld [vmem:[#allocation3 + $0x54] ss:$8 sps:$4 sm:$0xff]   ;;  %v852_v22 = vld [vmem:[#allocation3 + $0x50] ss:$8 sps:$4 sm:$0xff]  }
  0x3b   : > { %v853_v23 = vld [vmem:[#allocation3 + $0x64] ss:$8 sps:$4 sm:$0xff]   ;;  %v855_v24 = vld [vmem:[#allocation3 + $0x60] ss:$8 sps:$4 sm:$0xff]   ;;  %v856_v25 = vld [vmem:[#allocation3 + $0x74] ss:$8 sps:$4 sm:$0xff]  }
  0x3c   : > { %280 = vmatpush1.bf16.msra.mxu0 %v258_v8  ;;  %v858_v26 = vld [vmem:[#allocation3 + $0x70] ss:$8 sps:$4 sm:$0xff]   ;;  %v859_v27 = vld [vmem:[#allocation3 + $0x84] ss:$8 sps:$4 sm:$0xff]   ;;  %v861_v28 = vld [vmem:[#allocation3 + $0x80] ss:$8 sps:$4 sm:$0xff]  }
  0x3d   : > { %553 = vmatpush1.bf16.msra.mxu1 %v840_v13  ;;  %v862_v29 = vld [vmem:[#allocation3 + $0x94] ss:$8 sps:$4 sm:$0xff]   ;;  %v864_v30 = vld [vmem:[#allocation3 + $0x90] ss:$8 sps:$4 sm:$0xff]   ;;  %v865_v31 = vld [vmem:[#allocation3 + $0xa4] ss:$8 sps:$4 sm:$0xff]  }
  0x3e   : > { %554 = vmatprep.subr.bf16.mxu1 %v841_v14  ;;  %v867_v32 = vld [vmem:[#allocation3 + $0xa0] ss:$8 sps:$4 sm:$0xff]   ;;  %v868_v33 = vld [vmem:[#allocation3 + $0xb4] ss:$8 sps:$4 sm:$0xff]   ;;  %v870_v34 = vld [vmem:[#allocation3 + $0xb0] ss:$8 sps:$4 sm:$0xff]  }
  0x3f   : > { %754 = vmatmul.mubr.msk.bf16.vlgmr.msra.gmra.mrb[0].mxu0 %vm270_vm0, %v833_v11  ;;  %v871_v35 = vld [vmem:[#allocation3 + $0xc4] ss:$8 sps:$4 sm:$0xff]   ;;  %v873_v36 = vld [vmem:[#allocation3 + $0xc0] ss:$8 sps:$4 sm:$0xff]   ;;  %v874_v37 = vld [vmem:[#allocation3 + $0xd4] ss:$8 sps:$4 sm:$0xff]  }
  0x40   : > { %319 = vmatprep.mubr.bf16.mxu0 %v960_v7  ;;  %v876_v38 = vld [vmem:[#allocation3 + $0xd0] ss:$8 sps:$4 sm:$0xff]   ;;  %v877_v39 = vld [vmem:[#allocation3 + $0xe4] ss:$8 sps:$4 sm:$0xff]   ;;  %v879_v40 = vld [vmem:[#allocation3 + $0xe0] ss:$8 sps:$4 sm:$0xff]  }
  0x41   : > { %555 = vmatpush1.bf16.msra.mxu1 %v843_v15  ;;  %v880_v41 = vld [vmem:[#allocation3 + $0xf4] ss:$8 sps:$4 sm:$0xff]   ;;  %v882_v42 = vld [vmem:[#allocation3 + $0xf0] ss:$8 sps:$4 sm:$0xff]   ;;  %v366_v43 = vld [vmem:[%s1045_s17] sm:$0xff]  ;;  %s915_s28 = scalar_lea.vmem %s1070_s27, 1024 }
  0x42   : > { %556 = vmatprep.subr.bf16.mxu1 %v844_v16  ;;  %v368_v44 = vld [vmem:[%s1045_s17 + $0x10] sm:$0xff]  ;;  %372 = vperm.xlu0 %831, %v366_v43   ;;  %v367_v45 = vld [vmem:[%s1045_s17 + $0x8] sm:$0xff]  ;;  %v369_v46 = vld [vmem:[%s1045_s17 + $0x18] sm:$0xff]  ;;  %p916_p6 = scmp.ne.s32.totalorder %s1070_s27, %s915_s28  ;;  %p923_p13 = scmp.lt.s32.totalorder %s915_s28, %s915_s28 }
  0x43   : > { %382 = vperm.xlu1 %832, %v368_v44  }
  0x44   : > { %p917_p10 = pnand %p916_p6, %p808_p4  ;;  %p924_p0 = por %p923_p13, %p922_p12 }
  0x45   : > { %557 = vmatpush1.bf16.msra.mxu1 %v846_v18 }
  0x46   : > { %558 = vmatprep.subr.bf16.mxu1 %v847_v19  ;;  %377 = vperm.xlu0 %831, %v367_v45   ;;  %p918_p11 = pneg %p917_p10 }
  0x47   : > { %755 = vmatmul.mubr.msk.bf16.gmra.mrb[4].mxu0 %vm270_vm0, %v834_v17  ;;  %387 = vperm.xlu1 %832, %v369_v46  }
  0x48   : > { %p925_p1 = pnand %p924_p0, %p918_p11 }
  0x49   : > { %559 = vmatpush1.bf16.msra.mxu1 %v849_v20 }
  0x4a   : > { %560 = vmatprep.subr.bf16.mxu1 %v850_v21 }
  0x4d   : > { %561 = vmatpush1.bf16.msra.mxu1 %v852_v22 }
  0x4e   : > { %562 = vmatprep.subr.bf16.mxu1 %v853_v23 }
  0x51   : > { %563 = vmatpush1.bf16.msra.mxu1 %v855_v24 }
  0x52   : > { %564 = vmatprep.subr.bf16.mxu1 %v856_v25 }
  0x55   : > { %565 = vmatpush1.bf16.msra.mxu1 %v858_v26 }
  0x56   : > { %566 = vmatprep.subr.bf16.mxu1 %v859_v27 }
  0x59   : > { %567 = vmatpush1.bf16.msra.mxu1 %v861_v28 }
  0x5a   : > { %568 = vmatprep.subr.bf16.mxu1 %v862_v29 }
  0x5d   : > { %569 = vmatpush1.bf16.msra.mxu1 %v864_v30 }
  0x5e   : > { %570 = vmatprep.subr.bf16.mxu1 %v865_v31 }
  0x61   : > { %571 = vmatpush1.bf16.msra.mxu1 %v867_v32 }
  0x62   : > { %572 = vmatprep.subr.bf16.mxu1 %v868_v33 }
  0x65   : > { %573 = vmatpush1.bf16.msra.mxu1 %v870_v34 }
  0x66   : > { %574 = vmatprep.subr.bf16.mxu1 %v871_v35 }
  0x69   : > { %575 = vmatpush1.bf16.msra.mxu1 %v873_v36 }
  0x6a   : > { %576 = vmatprep.subr.bf16.mxu1 %v874_v37 }
  0x6d   : > { %577 = vmatpush1.bf16.msra.mxu1 %v876_v38 }
  0x6e   : > { %578 = vmatprep.subr.bf16.mxu1 %v877_v39 }
  0x71   : > { %579 = vmatpush1.bf16.msra.mxu1 %v879_v40 }
  0x72   : > { %580 = vmatprep.subr.bf16.mxu1 %v880_v41 }
  0x75   : > { %581 = vmatpush1.bf16.msra.mxu1 %v882_v42 }
  0xc1   : > { %v373_v59 = vpop.permute.xlu0 %372 }
  0xc2   : > { %v383_v6 = vpop.permute.xlu1 %382 }
  0xc5   : > { %v378_v61 = vpop.permute.xlu0 %377 }
  0xc6   : > { %v388_v19 = vpop.permute.xlu1 %387 }
 0x112   : > { %v311_v47 = vpop.f32.mrb[0].mxu0 }
 0x113   : > { %v313_v48 = vpop.f32.mrb[1].mxu0 }
 0x114   : > { %v315_v49 = vpop.f32.mrb[2].mxu0 }
 0x115   : > { %v330_v50 = vpack.c.bf16 %v315_v49, %v311_v47  ;;  %v317_v51 = vpop.f32.mrb[3].mxu0 }
 0x116   : > { %v331_v52 = vpack.c.bf16 %v317_v51, %v313_v48 }
 0x118   : > { %582 = vmatprep.mubr.bf16.mxu1 %v331_v52 }
 0x119   : > { %583 = vmatmul.mubr.bf16.vlgmr.msra.gmra.mrb[0].mxu1 %v330_v50 }
 0x11a   : > { %v321_v53 = vpop.f32.mrb[4].mxu0 }
 0x11b   : > { %v323_v54 = vpop.f32.mrb[5].mxu0 }
 0x11c   : > { %v325_v55 = vpop.f32.mrb[6].mxu0 }
 0x11d   : > { %v332_v56 = vpack.c.bf16 %v325_v55, %v321_v53  ;;  %v327_v57 = vpop.f32.mrb[7].mxu0 }
 0x11e   : > { %v333_v58 = vpack.c.bf16 %v327_v57, %v323_v54 }
 0x120   : > { %592 = vmatprep.mubr.bf16.mxu1 %v333_v58 }
 0x121   : > { %593 = vmatmul.mubr.bf16.gmra.mrb[4].mxu1 %v332_v56 }
 0x1ec   : > { %v584_v60 = vpop.f32.mrb[0].mxu1 }
 0x1ed   : > { %v585_v62 = vadd.f32 %v584_v60, %v373_v59  ;;  %v586_v63 = vpop.f32.mrb[1].mxu1 }
 0x1ee   : > { %v587_v0 = vadd.f32 %v586_v63, %v373_v59  ;;  %v588_v1 = vpop.f32.mrb[2].mxu1 }
 0x1ef   : > { %v603_v2 = vmax.f32 %v585_v62, 0.0  ;;  %v589_v3 = vadd.f32 %v588_v1, %v378_v61  ;;  %v590_v4 = vpop.f32.mrb[3].mxu1 }
 0x1f0   : > { %v604_v5 = vmax.f32 %v587_v0, 0.0  ;;  %v591_v7 = vadd.f32 %v590_v4, %v378_v61 }
 0x1f1   : > { %v605_v8 = vmax.f32 %v589_v3, 0.0  ;;  %v611_v10 = vmul.f32 %v603_v2, %v603_v2 }
 0x1f2   : > { %v606_v9 = vmax.f32 %v591_v7, 0.0  ;;  %v612_v12 = vmul.f32 %v604_v5, %v604_v5 }
 0x1f3   : > { %v613_v11 = vmul.f32 %v605_v8, %v605_v8 }
 0x1f4   : > { %v614_v13 = vmul.f32 %v606_v9, %v606_v9  ;;  %v594_v14 = vpop.f32.mrb[4].mxu1 }
 0x1f5   : > { %v619_v15 = vadd.f32 %v613_v11, %v611_v10  ;;  %v595_v16 = vadd.f32 %v594_v14, %v383_v6  ;;  %v596_v17 = vpop.f32.mrb[5].mxu1 }
 0x1f6   : > { %v628_v18 = vadd.f32 %v614_v13, %v612_v12  ;;  %v597_v20 = vadd.f32 %v596_v17, %v383_v6  ;;  %v598_v21 = vpop.f32.mrb[6].mxu1 }
 0x1f7   : > { %v607_v22 = vmax.f32 %v595_v16, 0.0  ;;  %v599_v23 = vadd.f32 %v598_v21, %v388_v19  ;;  %v600_v24 = vpop.f32.mrb[7].mxu1 }
 0x1f8   : > { %v608_v25 = vmax.f32 %v597_v20, 0.0  ;;  %v601_v26 = vadd.f32 %v600_v24, %v388_v19 }
 0x1f9   : > { %v615_v27 = vmul.f32 %v607_v22, %v607_v22  ;;  %v609_v28 = vmax.f32 %v599_v23, 0.0 }
 0x1fa   : > { %v616_v29 = vmul.f32 %v608_v25, %v608_v25  ;;  %v610_v30 = vmax.f32 %v601_v26, 0.0 }
 0x1fb   : > { %v620_v31 = vadd.f32 %v619_v15, %v615_v27  ;;  %v617_v32 = vmul.f32 %v609_v28, %v609_v28 }
 0x1fc   : > { %v629_v33 = vadd.f32 %v628_v18, %v616_v29  ;;  %v618_v34 = vmul.f32 %v610_v30, %v610_v30 }
 0x1fd   : > { %v621_v35 = vadd.f32 %v620_v31, %v617_v32 }
 0x1fe   : > { %v630_v36 = vadd.f32 %v629_v33, %v618_v34 }
 0x1ff   : > { %v622_v37 = vrot.slane %v621_v35, 4 }
 0x200   : > { %v631_v38 = vrot.slane %v630_v36, 4 }
 0x201   : > { %v623_v39 = vadd.f32 %v622_v37, %v621_v35 }
 0x202   : > { %v632_v40 = vadd.f32 %v631_v38, %v630_v36 }
 0x203   : > { %v624_v41 = vrot.slane %v623_v39, 2 }
 0x204   : > { %v633_v42 = vrot.slane %v632_v40, 2 }
 0x205   : > { %v625_v43 = vadd.f32 %v624_v41, %v623_v39 }
 0x206   : > { %v634_v44 = vadd.f32 %v633_v42, %v632_v40 }
 0x207   : > { %v626_v45 = vrot.slane %v625_v43, 1 }
 0x208   : > { %v635_v46 = vrot.slane %v634_v44, 1 }
 0x209   : > { %v627_v47 = vadd.f32 %v626_v45, %v625_v43 }
 0x20a   : > { %v636_v48 = vadd.f32 %v635_v46, %v634_v44 }
 0x20b   : > { %v637_v49 = vmax.f32 %v627_v47, 1e-24 }
 0x20c   : > { %v638_v50 = vmax.f32 %v636_v48, 1e-24 }
 0x20d   : > { %883 = vrsqrt.f32 %v637_v49 }
 0x20e   : > { %885 = vrsqrt.f32 %v638_v50 }
 0x217   : > { %v884_v51 = vpop.eup %883 }
 0x218   : > { %v886_v52 = vpop.eup %885  ;;  %v645_v53 = vmul.f32 %v884_v51, %v607_v22  ;;  %v647_v54 = vmul.f32 %v884_v51, %v609_v28  ;;  %v641_v55 = vmul.f32 %v884_v51, %v603_v2  ;;  %v643_v56 = vmul.f32 %v884_v51, %v605_v8 }
 0x219   : > { %v646_v57 = vmul.f32 %v886_v52, %v608_v25  ;;  %v648_v58 = vmul.f32 %v886_v52, %v610_v30  ;;  %v642_v59 = vmul.f32 %v886_v52, %v604_v5  ;;  %v644_v60 = vmul.f32 %v886_v52, %v606_v9 }
 0x21a   : > { %v651_v61 = vpack.c.bf16 %v647_v54, %v645_v53  ;;  %661 = vst [vmem:[#allocation6 + $0x20] sm:$0xff] %v645_v53  ;;  %663 = vst [vmem:[#allocation6 + $0x30] sm:$0xff] %v647_v54  ;;  %v649_v62 = vpack.c.bf16 %v643_v56, %v641_v55 }
 0x21b   : > { %657 = vst [vmem:[#allocation6] sm:$0xff] %v641_v55  ;;  %659 = vst [vmem:[#allocation6 + $0x10] sm:$0xff] %v643_v56  ;;  %v652_v63 = vpack.c.bf16 %v648_v58, %v646_v57  ;;  %v650_v0 = vpack.c.bf16 %v644_v60, %v642_v59 }
 0x21c   : > { %662 = vst [vmem:[#allocation6 + $0x28] sm:$0xff] %v646_v57  ;;  %664 = vst [vmem:[#allocation6 + $0x38] sm:$0xff] %v648_v58 }
 0x21d   : > { %658 = vst [vmem:[#allocation6 + $0x8] sm:$0xff] %v642_v59  ;;  %660 = vst [vmem:[#allocation6 + $0x18] sm:$0xff] %v644_v60 }
 0x21e   : > { %655 = vst [vmem:[#allocation2 + $0x10] sm:$0xff] %v651_v61  ;;  %653 = vst [vmem:[#allocation2] sm:$0xff] %v649_v62 }
 0x21f   : > { %928 = shalt.err (!%p925_p1)
}
 0x220   : > { %s929_s5 = scalar_lea.hbm %s1106_s4, 1024 }
 0x221   : > { %p930_p5 = scmp.ne.s32.totalorder %s1106_s4, %s929_s5  ;;  %p935_p8 = scmp.lt.u32.totalorder %s929_s5, %s1106_s4 }
 0x223   : > { %p931_p7 = pnand %p930_p5, %p808_p4 }
 0x225   : > { %p932_p9 = pneg %p931_p7 }
 0x227   : > { %p937_p2 = pnand %p935_p8, %p932_p9 }
 0x229   : > { %940 = shalt.err (!%p937_p2)
}
 0x22a   : > { %s962_s10 = smov 256   ;;  %s963_s11 = smov 16   ;;  %656 = vst [vmem:[#allocation2 + $0x18] sm:$0xff] %v652_v63  ;;  %654 = vst [vmem:[#allocation2 + $0x8] sm:$0xff] %v650_v0 }
 0x22b   : > { %799 = dma.vmem_to_hbm [thread:$0]  (%p808_p4), %s1070_s27, 1024, %s1106_s4, [#allocation5], %s962_s10, %s962_s10, %s963_s11  }
 0x22c   : > { %950 = dma.done.wait (%p808_p4), [#allocation5], 1024  }
 0x22d   : > { %952 = vsyncadd (%p808_p4), [#allocation5], 4294966272 }
 0x22e PF: > { %s16_s15 = sadd.s32 1, %s955_s15  }
 0x22f   : > { %p13_p3 = scmp.ge.s32.totalorder %s16_s15, 5  }
 0x231   :  { %15 = sbr.rel (!%p13_p3) target bundleno = 2 (0x2), region = 75 }
 0x238   :  { %687 = vsyncpa [#allocation4], 1 }
 0x239   :  { %689 = vsyncpa [#allocation4 + $0x1], 1 }
 0x23a   :  { %690 = vsyncpa [#allocation5], 1 }
 0x23b   :  { %692 = vsyncpa [#allocation5 + $0x1], 1 }

</bundles_post_ra>
